<compile_context>
chip_gen: v5e
topology: v5e:2x2
jax: 0.10.0
libtpu: 0.0.40
codegen_flags: <defaults>
</compile_context>

<pallas_src>
import functools

import jax
import jax.numpy as jnp
import numpy as np
from jax import lax
from jax.experimental import pallas as pl
from jax.experimental.pallas import tpu as pltpu


# ----------------------------------------------------------------------------
# Fused Encoder kernel
# ----------------------------------------------------------------------------
def _make_encoder_kernel(*, K, pad, Wout, M_total, has_ds):
    """Fused Encoder kernel.

    Activations are (channels, M_total) f32 tiles, M_total = Nb*Ho*Wo (>=128 lanes).
    Unit-stride KxK convs: im2col slab assembled with pltpu.roll + static masks,
    then one (Cout, K*K*C) @ (K*K*C, M_total) MXU dot.
    """
    taps = [(kh, kw) for kh in range(K) for kw in range(K)]
    shifts = [(kh - pad) * Wout + (kw - pad) for kh, kw in taps]

    def kernel(p1_ref, xds_ref, mask_ref,
               w11_ref, b11_ref, w12_ref, b12_ref,
               w21_ref, b21_ref, w22_ref, b22_ref, *rest):
        if has_ds:
            wd_ref, bd_ref, o_ref = rest
        else:
            (o_ref,) = rest

        def conv_unit(x, w_ref, b_ref):
            # Per-tap spatial shift == lane roll of the flattened Ho*Wo axis;
            # out-of-image taps zeroed by the static boundary mask.  The K*K
            # shifted copies stack on sublanes into one (K*K*C, M_total) slab,
            # consumed by a single deep-contraction MXU dot.
            parts = []
            for t, s in enumerate(shifts):
                xs = x if s == 0 else pltpu.roll(x, (-s) % M_total, 1)
                parts.append(xs * mask_ref[t:t + 1, :])
            slab = jnp.concatenate(parts, axis=0)
            return jnp.dot(w_ref[...], slab,
                           preferred_element_type=jnp.float32) + b_ref[...]

        # ---------------- block 1 ----------------
        # conv1 (stride s): the im2col slab of the kernel *input* was built in the
        # wrapper, so this is a single dense dot (no stride handling in-kernel).
        y1 = jnp.maximum(
            jnp.dot(w11_ref[...], p1_ref[0],
                    preferred_element_type=jnp.float32) + b11_ref[...], 0.0)
        if has_ds:   # 1x1 stride-s conv + folded BN on the strided input
            res1 = jnp.dot(wd_ref[...], xds_ref[0],
                           preferred_element_type=jnp.float32) + bd_ref[...]
        else:        # identity residual (Cin == Cout, spatial preserved)
            res1 = xds_ref[0]
        z1 = jnp.maximum(conv_unit(y1, w12_ref, b12_ref) + res1, 0.0)

        # ---------------- block 2 ----------------
        y2 = jnp.maximum(conv_unit(z1, w21_ref, b21_ref), 0.0)
        o_ref[0] = jnp.maximum(conv_unit(y2, w22_ref, b22_ref) + z1,
                               0.0).astype(o_ref.dtype)

    return kernel


# ----------------------------------------------------------------------------
# Wrapper helpers: BN folding, static masks, wrapper-side im2col, batch packing
# ----------------------------------------------------------------------------
def _fold_conv_fused(w_hwio, scale, shift):
    """HWIO weights + folded BN -> ((Cout, K*K*Cin) scaled weight, (Cout,1) shift).

    Column ordering is tap-major then input-channel, matching the im2col slab
    row ordering used by both the wrapper and the kernel.
    """
    KH, KW, Cin, Cout = w_hwio.shape
    w = w_hwio.reshape(KH * KW, Cin, Cout)
    w = jnp.transpose(w, (2, 0, 1)).reshape(Cout, KH * KW * Cin)
    w = w * scale.reshape(Cout, 1)
    return w.astype(jnp.float32), shift.reshape(Cout, 1).astype(jnp.float32)


def _boundary_masks(K, pad, Ho, Wo, Nb):
    """(K*K, Nb*Ho*Wo) f32 {0,1}: 1 where tap (kh,kw) reads inside the image."""
    i = np.arange(Ho)[:, None]
    j = np.arange(Wo)[None, :]
    masks = []
    for kh in range(K):
        for kw in range(K):
            r, c = i + kh - pad, j + kw - pad
            m = ((r >= 0) & (r < Ho) & (c >= 0) & (c < Wo)).astype(np.float32)
            masks.append(m.reshape(Ho * Wo))
    m = np.stack(masks, axis=0)            # (K*K, Ho*Wo)
    return np.tile(m, (1, Nb))             # per-image periodic along the lane axis


def _im2col_input(x_nchw, K, stride, pad, Ho, Wo):
    """(N, K*K*Cin, Ho*Wo) im2col of the input (plain XLA, built once per call)."""
    N, C, H, W = x_nchw.shape
    xp = jnp.pad(x_nchw, ((0, 0), (0, 0), (pad, pad), (pad, pad)))
    cols = []
    for kh in range(K):
        for kw in range(K):
            patch = xp[:, :, kh:kh + stride * (Ho - 1) + 1:stride,
                             kw:kw + stride * (Wo - 1) + 1:stride]
            cols.append(patch.reshape(N, C, Ho * Wo))
    return jnp.concatenate(cols, axis=1)


def _group_batch(a, G, Nb):
    """(N, R, M) -> (G, R, Nb*M): pack Nb images along the lane axis per grid step."""
    N, R, M = a.shape
    return a.reshape(G, Nb, R, M).transpose(0, 2, 1, 3).reshape(G, R, Nb * M)


# ----------------------------------------------------------------------------
# Encoder wrapper: single pallas_call
# ----------------------------------------------------------------------------
def encoder(x_nchw, params, *, stride, padding):
    N, Cin, H, W = x_nchw.shape
    p1, p2 = params["block1"], params["block2"]
    K = p1["w1"].shape[0]
    Cout = p1["w1"].shape[3]
    assert 2 * padding == K - 1, "residual adds require spatial-preserving unit-stride convs"
    Ho = (H + 2 * padding - K) // stride + 1
    Wo = (W + 2 * padding - K) // stride + 1
    Mo = Ho * Wo
    has_ds = stride > 1
    if not has_ds:
        assert Cin == Cout, "identity residual requires Cin == Cout"

    # Pack Nb images per grid step so the lane axis is >=128 (unmasked vst,
    # full-vreg VPU ops); remaining steps stay "parallel" for v7x's two TCs when
    # the batch is larger.
    Nb = min(N, max(1, -(-128 // Mo)))
    while N % Nb:
        Nb -= 1
    G = N // Nb
    M_total = Nb * Mo

    # BN folded into conv weights (inference-mode running stats).
    w11, b11 = _fold_conv_fused(p1["w1"], p1["s1"], p1["b1"])
    w12, b12 = _fold_conv_fused(p1["w2"], p1["s2"], p1["b2"])
    w21, b21 = _fold_conv_fused(p2["w1"], p2["s1"], p2["b1"])
    w22, b22 = _fold_conv_fused(p2["w2"], p2["s2"], p2["b2"])

    x32 = x_nchw.astype(jnp.float32)
    # im2col slab of the input for the strided conv1 (tiny; built once by XLA).
    patches1 = _group_batch(_im2col_input(x32, K, stride, padding, Ho, Wo), G, Nb)
    # Strided (or identity) input for the residual / 1x1 downsample path.
    xds = _group_batch(x32[:, :, ::stride, ::stride].reshape(N, Cin, Mo), G, Nb)
    # Static boundary masks for the unit-stride convs (constant, bf16-exact 0/1).
    masks = jnp.asarray(_boundary_masks(K, padding, Ho, Wo, Nb))

    def const(shape):
        return pl.BlockSpec(shape, lambda g, _s=shape: (0,) * len(_s))

    args = [patches1, xds, masks, w11, b11, w12, b12, w21, b21, w22, b22]
    in_specs = [
        pl.BlockSpec((1, K * K * Cin, M_total), lambda g: (g, 0, 0)),
        pl.BlockSpec((1, Cin, M_total), lambda g: (g, 0, 0)),
        const((K * K, M_total)),
        const((Cout, K * K * Cin)), const((Cout, 1)),
        const((Cout, K * K * Cout)), const((Cout, 1)),
        const((Cout, K * K * Cout)), const((Cout, 1)),
        const((Cout, K * K * Cout)), const((Cout, 1)),
    ]
    if has_ds:
        wd, bd = _fold_conv_fused(p1["wd"], p1["sd"], p1["bd"])
        args += [wd, bd]
        in_specs += [const((Cout, Cin)), const((Cout, 1))]

    kernel = _make_encoder_kernel(K=K, pad=padding, Wout=Wo,
                                  M_total=M_total, has_ds=has_ds)

    out = pl.pallas_call(
        kernel,
        out_shape=jax.ShapeDtypeStruct((G, Cout, M_total), jnp.float32),
        grid=(G,),
        in_specs=in_specs,
        out_specs=pl.BlockSpec((1, Cout, M_total), lambda g: (g, 0, 0)),
        compiler_params=pltpu.CompilerParams(dimension_semantics=("parallel",)),
    )(*args)

    # (G, Cout, Nb*Mo) -> (N, Cout, Ho, Wo): wrapper-side layout plumbing only.
    out = out.reshape(G, Cout, Nb, Mo).transpose(0, 2, 1, 3)
    return out.reshape(N, Cout, Ho, Wo)


# ----------------------------------------------------------------------------
# Deterministic synthetic parameters
# ----------------------------------------------------------------------------
def _fold_bn(gamma, beta, mean, var, eps=1e-5):
    scale = gamma / jnp.sqrt(var + eps)
    shift = beta - mean * scale
    return scale, shift


def _init_bn(key, c):
    k1, k2, k3, k4 = jax.random.split(key, 4)
    gamma = 1.0 + 0.1 * jax.random.normal(k1, (c,), jnp.float32)
    beta = 0.1 * jax.random.normal(k2, (c,), jnp.float32)
    mean = 0.1 * jax.random.normal(k3, (c,), jnp.float32)
    var = 1.0 + 0.1 * jnp.abs(jax.random.normal(k4, (c,), jnp.float32))
    return _fold_bn(gamma, beta, mean, var)


def _init_conv(key, kh, kw, cin, cout):
    fan_in = kh * kw * cin
    return jax.random.normal(key, (kh, kw, cin, cout), jnp.float32) * (2.0 / fan_in) ** 0.5


def init_basic_block(key, cin, cout, k, stride):
    keys = jax.random.split(key, 6)
    p = {}
    p["w1"] = _init_conv(keys[0], k, k, cin, cout)
    p["s1"], p["b1"] = _init_bn(keys[1], cout)
    p["w2"] = _init_conv(keys[2], k, k, cout, cout)
    p["s2"], p["b2"] = _init_bn(keys[3], cout)
    if stride > 1:
        p["wd"] = _init_conv(keys[4], 1, 1, cin, cout)
        p["sd"], p["bd"] = _init_bn(keys[5], cout)
    return p


def init_encoder(key, cin, cout, k, stride):
    k1, k2 = jax.random.split(key)
    return {
        "block1": init_basic_block(k1, cin, cout, k, stride),
        "block2": init_basic_block(k2, cout, cout, k, 1),
    }


# ----------------------------------------------------------------------------
# Pure-JAX reference (mirrors the PyTorch forward, BN in eval mode)
# ----------------------------------------------------------------------------
def _ref_conv_bn_act(x, w, scale, shift, *, stride, padding, relu, residual=None):
    y = lax.conv_general_dilated(
        x, w, (stride, stride), [(padding, padding), (padding, padding)],
        dimension_numbers=("NHWC", "HWIO", "NHWC"))
    y = y * scale + shift
    if residual is not None:
        y = y + residual
    if relu:
        y = jnp.maximum(y, 0.0)
    return y


def _ref_basic_block(x, p, *, stride, padding):
    out = _ref_conv_bn_act(x, p["w1"], p["s1"], p["b1"],
                           stride=stride, padding=padding, relu=True)
    residual = x
    if stride > 1:
        residual = _ref_conv_bn_act(x, p["wd"], p["sd"], p["bd"],
                                    stride=stride, padding=0, relu=False)
    out = _ref_conv_bn_act(out, p["w2"], p["s2"], p["b2"],
                           stride=1, padding=padding, relu=True, residual=residual)
    return out


def ref_encoder(x_nchw, params, *, stride, padding):
    x = jnp.transpose(x_nchw, (0, 2, 3, 1))
    x = _ref_basic_block(x, params["block1"], stride=stride, padding=padding)
    x = _ref_basic_block(x, params["block2"], stride=1, padding=padding)
    return jnp.transpose(x, (0, 3, 1, 2))


# ----------------------------------------------------------------------------
if __name__ == "__main__":
    key = jax.random.PRNGKey(0)
    kx, kp = jax.random.split(key)

    # Encoder(in_planes=4, out_planes=8, kernel_size=3, stride=2, padding=1)
    N, Cin, H, W = 2, 4, 16, 16
    Cout, K, stride, padding = 8, 3, 2, 1

    x = jax.random.normal(kx, (N, Cin, H, W), jnp.float32)   # NCHW (PyTorch convention)
    params = init_encoder(kp, Cin, Cout, K, stride)

    run = jax.jit(functools.partial(encoder, stride=stride, padding=padding))
    out = jax.block_until_ready(run(x, params))

    assert out.shape == (N, Cout, H // stride, W // stride), out.shape

    ref = ref_encoder(x, params, stride=stride, padding=padding)
    np.testing.assert_allclose(np.asarray(out), np.asarray(ref), rtol=2e-3, atol=2e-3)

    print("KERNEL_OK")
</pallas_src>

<mosaic_0001>
module attributes {stable_mosaic.version = 11 : i64} {
  func.func @kernel(%arg0: i32, %arg1: memref<1x36x128xf32, #tpu.memory_space<vmem>>, %arg2: memref<1x4x128xf32, #tpu.memory_space<vmem>>, %arg3: memref<9x128xf32, #tpu.memory_space<vmem>>, %arg4: memref<8x36xf32, #tpu.memory_space<vmem>>, %arg5: memref<8x1xf32, #tpu.memory_space<vmem>>, %arg6: memref<8x72xf32, #tpu.memory_space<vmem>>, %arg7: memref<8x1xf32, #tpu.memory_space<vmem>>, %arg8: memref<8x72xf32, #tpu.memory_space<vmem>>, %arg9: memref<8x1xf32, #tpu.memory_space<vmem>>, %arg10: memref<8x72xf32, #tpu.memory_space<vmem>>, %arg11: memref<8x1xf32, #tpu.memory_space<vmem>>, %arg12: memref<8x4xf32, #tpu.memory_space<vmem>>, %arg13: memref<8x1xf32, #tpu.memory_space<vmem>>, %arg14: memref<1x8x128xf32, #tpu.memory_space<vmem>>) attributes {dimension_semantics = [#tpu.dimension_semantics<parallel>], iteration_bounds = array<i64: 1>, scalar_prefetch = 0 : i64, scratch_operands = 0 : i64, tpu.core_type = #tpu.core_type<tc>, window_params = [{transform_indices = @transform_0, window_bounds = array<i64: 1, 36, 128>}, {transform_indices = @transform_1, window_bounds = array<i64: 1, 4, 128>}, {pipeline_mode = #tpu.pipeline_mode<synchronous>, transform_indices = @transform_2, window_bounds = array<i64: 9, 128>}, {pipeline_mode = #tpu.pipeline_mode<synchronous>, transform_indices = @transform_3, window_bounds = array<i64: 8, 36>}, {pipeline_mode = #tpu.pipeline_mode<synchronous>, transform_indices = @transform_4, window_bounds = array<i64: 8, 1>}, {pipeline_mode = #tpu.pipeline_mode<synchronous>, transform_indices = @transform_5, window_bounds = array<i64: 8, 72>}, {pipeline_mode = #tpu.pipeline_mode<synchronous>, transform_indices = @transform_6, window_bounds = array<i64: 8, 1>}, {pipeline_mode = #tpu.pipeline_mode<synchronous>, transform_indices = @transform_7, window_bounds = array<i64: 8, 72>}, {pipeline_mode = #tpu.pipeline_mode<synchronous>, transform_indices = @transform_8, window_bounds = array<i64: 8, 1>}, {pipeline_mode = #tpu.pipeline_mode<synchronous>, transform_indices = @transform_9, window_bounds = array<i64: 8, 72>}, {pipeline_mode = #tpu.pipeline_mode<synchronous>, transform_indices = @transform_10, window_bounds = array<i64: 8, 1>}, {pipeline_mode = #tpu.pipeline_mode<synchronous>, transform_indices = @transform_11, window_bounds = array<i64: 8, 4>}, {pipeline_mode = #tpu.pipeline_mode<synchronous>, transform_indices = @transform_12, window_bounds = array<i64: 8, 1>}, {transform_indices = @transform_13, window_bounds = array<i64: 1, 8, 128>}]} {
    %c0 = arith.constant 0 : index
    %c0_0 = arith.constant 0 : index
    %0 = vector.load %arg4[%c0, %c0_0] : memref<8x36xf32, #tpu.memory_space<vmem>>, vector<8x36xf32>
    %c0_1 = arith.constant 0 : index
    %c0_2 = arith.constant 0 : index
    %c0_3 = arith.constant 0 : index
    %1 = vector.load %arg1[%c0_1, %c0_2, %c0_3] : memref<1x36x128xf32, #tpu.memory_space<vmem>>, vector<1x36x128xf32>
    %2 = vector.shape_cast %1 : vector<1x36x128xf32> to vector<36x128xf32>
    %cst = arith.constant dense<0.000000e+00> : vector<8x128xf32>
    %3 = tpu.matmul %0, %2, %cst {dimension_numbers = #tpu.dot_dimension_numbers<[1], [0], [0], [1], [0, 0, 1, 1], [], []>} : vector<8x36xf32>, vector<36x128xf32>, vector<8x128xf32> -> vector<8x128xf32>
    %c0_4 = arith.constant 0 : index
    %c0_5 = arith.constant 0 : index
    %4 = vector.load %arg5[%c0_4, %c0_5] : memref<8x1xf32, #tpu.memory_space<vmem>>, vector<8x1xf32>
    %5 = vector.broadcast %4 : vector<8x1xf32> to vector<8x128xf32>
    %6 = arith.addf %3, %5 : vector<8x128xf32>
    %cst_6 = arith.constant 0.000000e+00 : f32
    %7 = vector.broadcast %cst_6 : f32 to vector<8x128xf32>
    %8 = arith.maximumf %6, %7 : vector<8x128xf32>
    %c0_7 = arith.constant 0 : index
    %c0_8 = arith.constant 0 : index
    %9 = vector.load %arg12[%c0_7, %c0_8] : memref<8x4xf32, #tpu.memory_space<vmem>>, vector<8x4xf32>
    %c0_9 = arith.constant 0 : index
    %c0_10 = arith.constant 0 : index
    %c0_11 = arith.constant 0 : index
    %10 = vector.load %arg2[%c0_9, %c0_10, %c0_11] : memref<1x4x128xf32, #tpu.memory_space<vmem>>, vector<1x4x128xf32>
    %11 = vector.shape_cast %10 : vector<1x4x128xf32> to vector<4x128xf32>
    %cst_12 = arith.constant dense<0.000000e+00> : vector<8x128xf32>
    %12 = tpu.matmul %9, %11, %cst_12 {dimension_numbers = #tpu.dot_dimension_numbers<[1], [0], [0], [1], [0, 0, 1, 1], [], []>} : vector<8x4xf32>, vector<4x128xf32>, vector<8x128xf32> -> vector<8x128xf32>
    %c0_13 = arith.constant 0 : index
    %c0_14 = arith.constant 0 : index
    %13 = vector.load %arg13[%c0_13, %c0_14] : memref<8x1xf32, #tpu.memory_space<vmem>>, vector<8x1xf32>
    %14 = vector.broadcast %13 : vector<8x1xf32> to vector<8x128xf32>
    %15 = arith.addf %12, %14 : vector<8x128xf32>
    %c9_i32 = arith.constant 9 : i32
    %16 = tpu.dynamic_rotate %8 by %c9_i32 dim 1 : vector<8x128xf32>, i32 -> vector<8x128xf32>
    %c0_15 = arith.constant 0 : index
    %c0_16 = arith.constant 0 : index
    %17 = vector.load %arg3[%c0_15, %c0_16] : memref<9x128xf32, #tpu.memory_space<vmem>>, vector<1x128xf32>
    %18 = vector.broadcast %17 : vector<1x128xf32> to vector<8x128xf32>
    %19 = arith.mulf %16, %18 : vector<8x128xf32>
    %c8_i32 = arith.constant 8 : i32
    %20 = tpu.dynamic_rotate %8 by %c8_i32 dim 1 : vector<8x128xf32>, i32 -> vector<8x128xf32>
    %c1 = arith.constant 1 : index
    %c0_17 = arith.constant 0 : index
    %21 = vector.load %arg3[%c1, %c0_17] : memref<9x128xf32, #tpu.memory_space<vmem>>, vector<1x128xf32>
    %22 = vector.broadcast %21 : vector<1x128xf32> to vector<8x128xf32>
    %23 = arith.mulf %20, %22 : vector<8x128xf32>
    %c7_i32 = arith.constant 7 : i32
    %24 = tpu.dynamic_rotate %8 by %c7_i32 dim 1 : vector<8x128xf32>, i32 -> vector<8x128xf32>
    %c2 = arith.constant 2 : index
    %c0_18 = arith.constant 0 : index
    %25 = vector.load %arg3[%c2, %c0_18] : memref<9x128xf32, #tpu.memory_space<vmem>>, vector<1x128xf32>
    %26 = vector.broadcast %25 : vector<1x128xf32> to vector<8x128xf32>
    %27 = arith.mulf %24, %26 : vector<8x128xf32>
    %c1_i32 = arith.constant 1 : i32
    %28 = tpu.dynamic_rotate %8 by %c1_i32 dim 1 : vector<8x128xf32>, i32 -> vector<8x128xf32>
    %c3 = arith.constant 3 : index
    %c0_19 = arith.constant 0 : index
    %29 = vector.load %arg3[%c3, %c0_19] : memref<9x128xf32, #tpu.memory_space<vmem>>, vector<1x128xf32>
    %30 = vector.broadcast %29 : vector<1x128xf32> to vector<8x128xf32>
    %31 = arith.mulf %28, %30 : vector<8x128xf32>
    %c4 = arith.constant 4 : index
    %c0_20 = arith.constant 0 : index
    %32 = vector.load %arg3[%c4, %c0_20] : memref<9x128xf32, #tpu.memory_space<vmem>>, vector<1x128xf32>
    %33 = vector.broadcast %32 : vector<1x128xf32> to vector<8x128xf32>
    %34 = arith.mulf %8, %33 : vector<8x128xf32>
    %c127_i32 = arith.constant 127 : i32
    %35 = tpu.dynamic_rotate %8 by %c127_i32 dim 1 : vector<8x128xf32>, i32 -> vector<8x128xf32>
    %c5 = arith.constant 5 : index
    %c0_21 = arith.constant 0 : index
    %36 = vector.load %arg3[%c5, %c0_21] : memref<9x128xf32, #tpu.memory_space<vmem>>, vector<1x128xf32>
    %37 = vector.broadcast %36 : vector<1x128xf32> to vector<8x128xf32>
    %38 = arith.mulf %35, %37 : vector<8x128xf32>
    %c121_i32 = arith.constant 121 : i32
    %39 = tpu.dynamic_rotate %8 by %c121_i32 dim 1 : vector<8x128xf32>, i32 -> vector<8x128xf32>
    %c6 = arith.constant 6 : index
    %c0_22 = arith.constant 0 : index
    %40 = vector.load %arg3[%c6, %c0_22] : memref<9x128xf32, #tpu.memory_space<vmem>>, vector<1x128xf32>
    %41 = vector.broadcast %40 : vector<1x128xf32> to vector<8x128xf32>
    %42 = arith.mulf %39, %41 : vector<8x128xf32>
    %c120_i32 = arith.constant 120 : i32
    %43 = tpu.dynamic_rotate %8 by %c120_i32 dim 1 : vector<8x128xf32>, i32 -> vector<8x128xf32>
    %c7 = arith.constant 7 : index
    %c0_23 = arith.constant 0 : index
    %44 = vector.load %arg3[%c7, %c0_23] : memref<9x128xf32, #tpu.memory_space<vmem>>, vector<1x128xf32>
    %45 = vector.broadcast %44 : vector<1x128xf32> to vector<8x128xf32>
    %46 = arith.mulf %43, %45 : vector<8x128xf32>
    %c119_i32 = arith.constant 119 : i32
    %47 = tpu.dynamic_rotate %8 by %c119_i32 dim 1 : vector<8x128xf32>, i32 -> vector<8x128xf32>
    %c8 = arith.constant 8 : index
    %c0_24 = arith.constant 0 : index
    %48 = vector.load %arg3[%c8, %c0_24] : memref<9x128xf32, #tpu.memory_space<vmem>>, vector<1x128xf32>
    %49 = vector.broadcast %48 : vector<1x128xf32> to vector<8x128xf32>
    %50 = arith.mulf %47, %49 : vector<8x128xf32>
    %51 = tpu.concatenate %19, %23, %27, %31, %34, %38, %42, %46, %50 in 0 : vector<8x128xf32>, vector<8x128xf32>, vector<8x128xf32>, vector<8x128xf32>, vector<8x128xf32>, vector<8x128xf32>, vector<8x128xf32>, vector<8x128xf32>, vector<8x128xf32> -> vector<72x128xf32>
    %c0_25 = arith.constant 0 : index
    %c0_26 = arith.constant 0 : index
    %52 = vector.load %arg6[%c0_25, %c0_26] : memref<8x72xf32, #tpu.memory_space<vmem>>, vector<8x72xf32>
    %cst_27 = arith.constant dense<0.000000e+00> : vector<8x128xf32>
    %53 = tpu.matmul %52, %51, %cst_27 {dimension_numbers = #tpu.dot_dimension_numbers<[1], [0], [0], [1], [0, 0, 1, 1], [], []>} : vector<8x72xf32>, vector<72x128xf32>, vector<8x128xf32> -> vector<8x128xf32>
    %c0_28 = arith.constant 0 : index
    %c0_29 = arith.constant 0 : index
    %54 = vector.load %arg7[%c0_28, %c0_29] : memref<8x1xf32, #tpu.memory_space<vmem>>, vector<8x1xf32>
    %55 = vector.broadcast %54 : vector<8x1xf32> to vector<8x128xf32>
    %56 = arith.addf %53, %55 : vector<8x128xf32>
    %57 = arith.addf %56, %15 : vector<8x128xf32>
    %cst_30 = arith.constant 0.000000e+00 : f32
    %58 = vector.broadcast %cst_30 : f32 to vector<8x128xf32>
    %59 = arith.maximumf %57, %58 : vector<8x128xf32>
    %c9_i32_31 = arith.constant 9 : i32
    %60 = tpu.dynamic_rotate %59 by %c9_i32_31 dim 1 : vector<8x128xf32>, i32 -> vector<8x128xf32>
    %c0_32 = arith.constant 0 : index
    %c0_33 = arith.constant 0 : index
    %61 = vector.load %arg3[%c0_32, %c0_33] : memref<9x128xf32, #tpu.memory_space<vmem>>, vector<1x128xf32>
    %62 = vector.broadcast %61 : vector<1x128xf32> to vector<8x128xf32>
    %63 = arith.mulf %60, %62 : vector<8x128xf32>
    %c8_i32_34 = arith.constant 8 : i32
    %64 = tpu.dynamic_rotate %59 by %c8_i32_34 dim 1 : vector<8x128xf32>, i32 -> vector<8x128xf32>
    %c1_35 = arith.constant 1 : index
    %c0_36 = arith.constant 0 : index
    %65 = vector.load %arg3[%c1_35, %c0_36] : memref<9x128xf32, #tpu.memory_space<vmem>>, vector<1x128xf32>
    %66 = vector.broadcast %65 : vector<1x128xf32> to vector<8x128xf32>
    %67 = arith.mulf %64, %66 : vector<8x128xf32>
    %c7_i32_37 = arith.constant 7 : i32
    %68 = tpu.dynamic_rotate %59 by %c7_i32_37 dim 1 : vector<8x128xf32>, i32 -> vector<8x128xf32>
    %c2_38 = arith.constant 2 : index
    %c0_39 = arith.constant 0 : index
    %69 = vector.load %arg3[%c2_38, %c0_39] : memref<9x128xf32, #tpu.memory_space<vmem>>, vector<1x128xf32>
    %70 = vector.broadcast %69 : vector<1x128xf32> to vector<8x128xf32>
    %71 = arith.mulf %68, %70 : vector<8x128xf32>
    %c1_i32_40 = arith.constant 1 : i32
    %72 = tpu.dynamic_rotate %59 by %c1_i32_40 dim 1 : vector<8x128xf32>, i32 -> vector<8x128xf32>
    %c3_41 = arith.constant 3 : index
    %c0_42 = arith.constant 0 : index
    %73 = vector.load %arg3[%c3_41, %c0_42] : memref<9x128xf32, #tpu.memory_space<vmem>>, vector<1x128xf32>
    %74 = vector.broadcast %73 : vector<1x128xf32> to vector<8x128xf32>
    %75 = arith.mulf %72, %74 : vector<8x128xf32>
    %c4_43 = arith.constant 4 : index
    %c0_44 = arith.constant 0 : index
    %76 = vector.load %arg3[%c4_43, %c0_44] : memref<9x128xf32, #tpu.memory_space<vmem>>, vector<1x128xf32>
    %77 = vector.broadcast %76 : vector<1x128xf32> to vector<8x128xf32>
    %78 = arith.mulf %59, %77 : vector<8x128xf32>
    %c127_i32_45 = arith.constant 127 : i32
    %79 = tpu.dynamic_rotate %59 by %c127_i32_45 dim 1 : vector<8x128xf32>, i32 -> vector<8x128xf32>
    %c5_46 = arith.constant 5 : index
    %c0_47 = arith.constant 0 : index
    %80 = vector.load %arg3[%c5_46, %c0_47] : memref<9x128xf32, #tpu.memory_space<vmem>>, vector<1x128xf32>
    %81 = vector.broadcast %80 : vector<1x128xf32> to vector<8x128xf32>
    %82 = arith.mulf %79, %81 : vector<8x128xf32>
    %c121_i32_48 = arith.constant 121 : i32
    %83 = tpu.dynamic_rotate %59 by %c121_i32_48 dim 1 : vector<8x128xf32>, i32 -> vector<8x128xf32>
    %c6_49 = arith.constant 6 : index
    %c0_50 = arith.constant 0 : index
    %84 = vector.load %arg3[%c6_49, %c0_50] : memref<9x128xf32, #tpu.memory_space<vmem>>, vector<1x128xf32>
    %85 = vector.broadcast %84 : vector<1x128xf32> to vector<8x128xf32>
    %86 = arith.mulf %83, %85 : vector<8x128xf32>
    %c120_i32_51 = arith.constant 120 : i32
    %87 = tpu.dynamic_rotate %59 by %c120_i32_51 dim 1 : vector<8x128xf32>, i32 -> vector<8x128xf32>
    %c7_52 = arith.constant 7 : index
    %c0_53 = arith.constant 0 : index
    %88 = vector.load %arg3[%c7_52, %c0_53] : memref<9x128xf32, #tpu.memory_space<vmem>>, vector<1x128xf32>
    %89 = vector.broadcast %88 : vector<1x128xf32> to vector<8x128xf32>
    %90 = arith.mulf %87, %89 : vector<8x128xf32>
    %c119_i32_54 = arith.constant 119 : i32
    %91 = tpu.dynamic_rotate %59 by %c119_i32_54 dim 1 : vector<8x128xf32>, i32 -> vector<8x128xf32>
    %c8_55 = arith.constant 8 : index
    %c0_56 = arith.constant 0 : index
    %92 = vector.load %arg3[%c8_55, %c0_56] : memref<9x128xf32, #tpu.memory_space<vmem>>, vector<1x128xf32>
    %93 = vector.broadcast %92 : vector<1x128xf32> to vector<8x128xf32>
    %94 = arith.mulf %91, %93 : vector<8x128xf32>
    %95 = tpu.concatenate %63, %67, %71, %75, %78, %82, %86, %90, %94 in 0 : vector<8x128xf32>, vector<8x128xf32>, vector<8x128xf32>, vector<8x128xf32>, vector<8x128xf32>, vector<8x128xf32>, vector<8x128xf32>, vector<8x128xf32>, vector<8x128xf32> -> vector<72x128xf32>
    %c0_57 = arith.constant 0 : index
    %c0_58 = arith.constant 0 : index
    %96 = vector.load %arg8[%c0_57, %c0_58] : memref<8x72xf32, #tpu.memory_space<vmem>>, vector<8x72xf32>
    %cst_59 = arith.constant dense<0.000000e+00> : vector<8x128xf32>
    %97 = tpu.matmul %96, %95, %cst_59 {dimension_numbers = #tpu.dot_dimension_numbers<[1], [0], [0], [1], [0, 0, 1, 1], [], []>} : vector<8x72xf32>, vector<72x128xf32>, vector<8x128xf32> -> vector<8x128xf32>
    %c0_60 = arith.constant 0 : index
    %c0_61 = arith.constant 0 : index
    %98 = vector.load %arg9[%c0_60, %c0_61] : memref<8x1xf32, #tpu.memory_space<vmem>>, vector<8x1xf32>
    %99 = vector.broadcast %98 : vector<8x1xf32> to vector<8x128xf32>
    %100 = arith.addf %97, %99 : vector<8x128xf32>
    %cst_62 = arith.constant 0.000000e+00 : f32
    %101 = vector.broadcast %cst_62 : f32 to vector<8x128xf32>
    %102 = arith.maximumf %100, %101 : vector<8x128xf32>
    %c9_i32_63 = arith.constant 9 : i32
    %103 = tpu.dynamic_rotate %102 by %c9_i32_63 dim 1 : vector<8x128xf32>, i32 -> vector<8x128xf32>
    %c0_64 = arith.constant 0 : index
    %c0_65 = arith.constant 0 : index
    %104 = vector.load %arg3[%c0_64, %c0_65] : memref<9x128xf32, #tpu.memory_space<vmem>>, vector<1x128xf32>
    %105 = vector.broadcast %104 : vector<1x128xf32> to vector<8x128xf32>
    %106 = arith.mulf %103, %105 : vector<8x128xf32>
    %c8_i32_66 = arith.constant 8 : i32
    %107 = tpu.dynamic_rotate %102 by %c8_i32_66 dim 1 : vector<8x128xf32>, i32 -> vector<8x128xf32>
    %c1_67 = arith.constant 1 : index
    %c0_68 = arith.constant 0 : index
    %108 = vector.load %arg3[%c1_67, %c0_68] : memref<9x128xf32, #tpu.memory_space<vmem>>, vector<1x128xf32>
    %109 = vector.broadcast %108 : vector<1x128xf32> to vector<8x128xf32>
    %110 = arith.mulf %107, %109 : vector<8x128xf32>
    %c7_i32_69 = arith.constant 7 : i32
    %111 = tpu.dynamic_rotate %102 by %c7_i32_69 dim 1 : vector<8x128xf32>, i32 -> vector<8x128xf32>
    %c2_70 = arith.constant 2 : index
    %c0_71 = arith.constant 0 : index
    %112 = vector.load %arg3[%c2_70, %c0_71] : memref<9x128xf32, #tpu.memory_space<vmem>>, vector<1x128xf32>
    %113 = vector.broadcast %112 : vector<1x128xf32> to vector<8x128xf32>
    %114 = arith.mulf %111, %113 : vector<8x128xf32>
    %c1_i32_72 = arith.constant 1 : i32
    %115 = tpu.dynamic_rotate %102 by %c1_i32_72 dim 1 : vector<8x128xf32>, i32 -> vector<8x128xf32>
    %c3_73 = arith.constant 3 : index
    %c0_74 = arith.constant 0 : index
    %116 = vector.load %arg3[%c3_73, %c0_74] : memref<9x128xf32, #tpu.memory_space<vmem>>, vector<1x128xf32>
    %117 = vector.broadcast %116 : vector<1x128xf32> to vector<8x128xf32>
    %118 = arith.mulf %115, %117 : vector<8x128xf32>
    %c4_75 = arith.constant 4 : index
    %c0_76 = arith.constant 0 : index
    %119 = vector.load %arg3[%c4_75, %c0_76] : memref<9x128xf32, #tpu.memory_space<vmem>>, vector<1x128xf32>
    %120 = vector.broadcast %119 : vector<1x128xf32> to vector<8x128xf32>
    %121 = arith.mulf %102, %120 : vector<8x128xf32>
    %c127_i32_77 = arith.constant 127 : i32
    %122 = tpu.dynamic_rotate %102 by %c127_i32_77 dim 1 : vector<8x128xf32>, i32 -> vector<8x128xf32>
    %c5_78 = arith.constant 5 : index
    %c0_79 = arith.constant 0 : index
    %123 = vector.load %arg3[%c5_78, %c0_79] : memref<9x128xf32, #tpu.memory_space<vmem>>, vector<1x128xf32>
    %124 = vector.broadcast %123 : vector<1x128xf32> to vector<8x128xf32>
    %125 = arith.mulf %122, %124 : vector<8x128xf32>
    %c121_i32_80 = arith.constant 121 : i32
    %126 = tpu.dynamic_rotate %102 by %c121_i32_80 dim 1 : vector<8x128xf32>, i32 -> vector<8x128xf32>
    %c6_81 = arith.constant 6 : index
    %c0_82 = arith.constant 0 : index
    %127 = vector.load %arg3[%c6_81, %c0_82] : memref<9x128xf32, #tpu.memory_space<vmem>>, vector<1x128xf32>
    %128 = vector.broadcast %127 : vector<1x128xf32> to vector<8x128xf32>
    %129 = arith.mulf %126, %128 : vector<8x128xf32>
    %c120_i32_83 = arith.constant 120 : i32
    %130 = tpu.dynamic_rotate %102 by %c120_i32_83 dim 1 : vector<8x128xf32>, i32 -> vector<8x128xf32>
    %c7_84 = arith.constant 7 : index
    %c0_85 = arith.constant 0 : index
    %131 = vector.load %arg3[%c7_84, %c0_85] : memref<9x128xf32, #tpu.memory_space<vmem>>, vector<1x128xf32>
    %132 = vector.broadcast %131 : vector<1x128xf32> to vector<8x128xf32>
    %133 = arith.mulf %130, %132 : vector<8x128xf32>
    %c119_i32_86 = arith.constant 119 : i32
    %134 = tpu.dynamic_rotate %102 by %c119_i32_86 dim 1 : vector<8x128xf32>, i32 -> vector<8x128xf32>
    %c8_87 = arith.constant 8 : index
    %c0_88 = arith.constant 0 : index
    %135 = vector.load %arg3[%c8_87, %c0_88] : memref<9x128xf32, #tpu.memory_space<vmem>>, vector<1x128xf32>
    %136 = vector.broadcast %135 : vector<1x128xf32> to vector<8x128xf32>
    %137 = arith.mulf %134, %136 : vector<8x128xf32>
    %138 = tpu.concatenate %106, %110, %114, %118, %121, %125, %129, %133, %137 in 0 : vector<8x128xf32>, vector<8x128xf32>, vector<8x128xf32>, vector<8x128xf32>, vector<8x128xf32>, vector<8x128xf32>, vector<8x128xf32>, vector<8x128xf32>, vector<8x128xf32> -> vector<72x128xf32>
    %c0_89 = arith.constant 0 : index
    %c0_90 = arith.constant 0 : index
    %139 = vector.load %arg10[%c0_89, %c0_90] : memref<8x72xf32, #tpu.memory_space<vmem>>, vector<8x72xf32>
    %cst_91 = arith.constant dense<0.000000e+00> : vector<8x128xf32>
    %140 = tpu.matmul %139, %138, %cst_91 {dimension_numbers = #tpu.dot_dimension_numbers<[1], [0], [0], [1], [0, 0, 1, 1], [], []>} : vector<8x72xf32>, vector<72x128xf32>, vector<8x128xf32> -> vector<8x128xf32>
    %c0_92 = arith.constant 0 : index
    %c0_93 = arith.constant 0 : index
    %141 = vector.load %arg11[%c0_92, %c0_93] : memref<8x1xf32, #tpu.memory_space<vmem>>, vector<8x1xf32>
    %142 = vector.broadcast %141 : vector<8x1xf32> to vector<8x128xf32>
    %143 = arith.addf %140, %142 : vector<8x128xf32>
    %144 = arith.addf %143, %59 : vector<8x128xf32>
    %cst_94 = arith.constant 0.000000e+00 : f32
    %145 = vector.broadcast %cst_94 : f32 to vector<8x128xf32>
    %146 = arith.maximumf %144, %145 : vector<8x128xf32>
    %c0_95 = arith.constant 0 : index
    %c0_96 = arith.constant 0 : index
    %c0_97 = arith.constant 0 : index
    %147 = vector.load %arg14[%c0_95, %c0_96, %c0_97] : memref<1x8x128xf32, #tpu.memory_space<vmem>>, vector<1x8x128xf32>
    %148 = vector.shape_cast %147 : vector<1x8x128xf32> to vector<8x128xf32>
    %149 = vector.shape_cast %146 : vector<8x128xf32> to vector<1x8x128xf32>
    tpu.vector_store %arg14[%c0_95, %c0_96, %c0_97], %149 {strides = array<i32>} : memref<1x8x128xf32, #tpu.memory_space<vmem>>, vector<1x8x128xf32>,
    return
  }
  func.func @transform_0(%arg0: i32) -> (i32, i32, i32) {
    %c0_i32 = arith.constant 0 : i32
    %c0_i32_0 = arith.constant 0 : i32
    %c0_i32_1 = arith.constant 0 : i32
    return %arg0, %c0_i32, %c0_i32_0 : i32, i32, i32
  }
  func.func @transform_1(%arg0: i32) -> (i32, i32, i32) {
    %c0_i32 = arith.constant 0 : i32
    %c0_i32_0 = arith.constant 0 : i32
    %c0_i32_1 = arith.constant 0 : i32
    return %arg0, %c0_i32, %c0_i32_0 : i32, i32, i32
  }
  func.func @transform_2(%arg0: i32) -> (i32, i32) {
    %c0_i32 = arith.constant 0 : i32
    %c0_i32_0 = arith.constant 0 : i32
    %c0_i32_1 = arith.constant 0 : i32
    return %c0_i32, %c0_i32_0 : i32, i32
  }
  func.func @transform_3(%arg0: i32) -> (i32, i32) {
    %c0_i32 = arith.constant 0 : i32
    %c0_i32_0 = arith.constant 0 : i32
    %c0_i32_1 = arith.constant 0 : i32
    return %c0_i32, %c0_i32_0 : i32, i32
  }
  func.func @transform_4(%arg0: i32) -> (i32, i32) {
    %c0_i32 = arith.constant 0 : i32
    %c0_i32_0 = arith.constant 0 : i32
    %c0_i32_1 = arith.constant 0 : i32
    return %c0_i32, %c0_i32_0 : i32, i32
  }
  func.func @transform_5(%arg0: i32) -> (i32, i32) {
    %c0_i32 = arith.constant 0 : i32
    %c0_i32_0 = arith.constant 0 : i32
    %c0_i32_1 = arith.constant 0 : i32
    return %c0_i32, %c0_i32_0 : i32, i32
  }
  func.func @transform_6(%arg0: i32) -> (i32, i32) {
    %c0_i32 = arith.constant 0 : i32
    %c0_i32_0 = arith.constant 0 : i32
    %c0_i32_1 = arith.constant 0 : i32
    return %c0_i32, %c0_i32_0 : i32, i32
  }
  func.func @transform_7(%arg0: i32) -> (i32, i32) {
    %c0_i32 = arith.constant 0 : i32
    %c0_i32_0 = arith.constant 0 : i32
    %c0_i32_1 = arith.constant 0 : i32
    return %c0_i32, %c0_i32_0 : i32, i32
  }
  func.func @transform_8(%arg0: i32) -> (i32, i32) {
    %c0_i32 = arith.constant 0 : i32
    %c0_i32_0 = arith.constant 0 : i32
    %c0_i32_1 = arith.constant 0 : i32
    return %c0_i32, %c0_i32_0 : i32, i32
  }
  func.func @transform_9(%arg0: i32) -> (i32, i32) {
    %c0_i32 = arith.constant 0 : i32
    %c0_i32_0 = arith.constant 0 : i32
    %c0_i32_1 = arith.constant 0 : i32
    return %c0_i32, %c0_i32_0 : i32, i32
  }
  func.func @transform_10(%arg0: i32) -> (i32, i32) {
    %c0_i32 = arith.constant 0 : i32
    %c0_i32_0 = arith.constant 0 : i32
    %c0_i32_1 = arith.constant 0 : i32
    return %c0_i32, %c0_i32_0 : i32, i32
  }
  func.func @transform_11(%arg0: i32) -> (i32, i32) {
    %c0_i32 = arith.constant 0 : i32
    %c0_i32_0 = arith.constant 0 : i32
    %c0_i32_1 = arith.constant 0 : i32
    return %c0_i32, %c0_i32_0 : i32, i32
  }
  func.func @transform_12(%arg0: i32) -> (i32, i32) {
    %c0_i32 = arith.constant 0 : i32
    %c0_i32_0 = arith.constant 0 : i32
    %c0_i32_1 = arith.constant 0 : i32
    return %c0_i32, %c0_i32_0 : i32, i32
  }
  func.func @transform_13(%arg0: i32) -> (i32, i32, i32) {
    %c0_i32 = arith.constant 0 : i32
    %c0_i32_0 = arith.constant 0 : i32
    %c0_i32_1 = arith.constant 0 : i32
    return %arg0, %c0_i32, %c0_i32_0 : i32, i32, i32
  }
}

</mosaic_0001>

<bundles_post_ra>
// kernel: encoder.1
= control target key start
LH: loop header
LB: loop body
LE: loop exit
PB: predicated region body
PF: predicated region fallthrough
CT: control target
= control target key end

     0   :  { %vm60_vm0 = vcmask 1043456   ;;  %v341_v2 = vmov 0   ;;  %vm56_vm1 = vcmask 293888   ;;  %vm93_vm2 = vcmask 31744   ;;  %s344_s25 = smov 119   ;;  %s347_s26 = smov 7   ;;  %s584_s0 = inlined_call_operand.vmem [shape: f32[1,36,128], index: 0, kind: input, shape index: {}]   ;;  %s585_s4 = inlined_call_operand.vmem [shape: f32[8,1], index: 4, kind: input, shape index: {}]   ;;  %s586_s3 = inlined_call_operand.vmem [shape: f32[8,36], index: 3, kind: input, shape index: {}]   ;;  %s587_s2 = inlined_call_operand.vmem [shape: f32[9,128], index: 2, kind: input, shape index: {}]   ;;  %s588_s1 = inlined_call_operand.vmem [shape: f32[1,4,128], index: 1, kind: input, shape index: {}]   ;;  %s589_s11 = inlined_call_operand.vmem [shape: f32[8,4], index: 11, kind: input, shape index: {}]   ;;  %s590_s12 = inlined_call_operand.vmem [shape: f32[8,1], index: 12, kind: input, shape index: {}]   ;;  %s591_s6 = inlined_call_operand.vmem [shape: f32[8,1], index: 6, kind: input, shape index: {}]   ;;  %s592_s5 = inlined_call_operand.vmem [shape: f32[8,72], index: 5, kind: input, shape index: {}]   ;;  %s593_s8 = inlined_call_operand.vmem [shape: f32[8,1], index: 8, kind: input, shape index: {}]   ;;  %s594_s7 = inlined_call_operand.vmem [shape: f32[8,72], index: 7, kind: input, shape index: {}]   ;;  %s595_s10 = inlined_call_operand.vmem [shape: f32[8,1], index: 10, kind: input, shape index: {}]   ;;  %s596_s9 = inlined_call_operand.vmem [shape: f32[8,72], index: 9, kind: input, shape index: {}]   ;;  %s597_s13 = inlined_call_operand.vmem [shape: f32[1,8,128], index: 13, kind: output, shape index: {}]  }
   0x1   :  { %v49_v0 = vld [vmem:[%s584_s0 + $0x20] sm:$0xf]  ;;  %v48_v1 = vld [vmem:[%s584_s0 + $0x18] sm:$0xff]  ;;  %330 = vset.pattern.permute.xlu0 %v341_v2  ;;  %331 = vset.pattern.permute.xlu1 %v341_v2  ;;  %v47_v3 = vld [vmem:[%s584_s0 + $0x10] sm:$0xff]  ;;  %s348_s29 = smov 9   ;;  %s349_s30 = smov 8  }
   0x2   :  { %314 = vmatpush.msk.msra.mxu0 %vm60_vm0, %v49_v0  ;;  %v50_v4 = vld [vmem:[%s585_s4] sm:$0xff]  ;;  %v46_v5 = vld [vmem:[%s584_s0 + $0x8] sm:$0xff]  ;;  %vm170_vm3 = vcmask 588800  }
   0x3   :  { %53 = vperm.xlu0 %330, %v50_v4   ;;  %v45_v6 = vld [vmem:[%s584_s0] sm:$0xff]  ;;  %s342_s0 = smov 127   ;;  %v466_v17 = vld [vmem:[%s587_s2 + $0x8] ss:$0 sm:$0xff] }
   0x4   :  { %76 = vmatpush.msra.mxu0 %v48_v1  ;;  %v44_v7 = vld [vmem:[%s586_s3] sm:$0xff]  ;;  %s343_s3 = smov 120  }
   0x5   :  { %v86_v8 = vld [vmem:[%s588_s1] sm:$0xf]  ;;  %s345_s1 = smov 1   ;;  %v471_v18 = vld [vmem:[%s587_s2 + $0x7] ss:$0 sm:$0xff] }
   0x6   :  { %77 = vmatpush.msra.mxu0 %v47_v3  ;;  %v85_v9 = vld [vmem:[%s589_s11] sm:$0xff]  ;;  %s346_s11 = smov 121  }
   0x7   :  { %v87_v14 = vld [vmem:[%s590_s12] sm:$0xff] }
   0x8   :  { %78 = vmatpush.msra.mxu0 %v46_v5  ;;  %v164_v15 = vld [vmem:[%s591_s6] sm:$0xff] }
   0x9   :  { %v478_v23 = vld [vmem:[%s587_s2 + $0x6] ss:$0 sm:$0xff]  ;;  %v483_v24 = vld [vmem:[%s587_s2 + $0x5] ss:$0 sm:$0xff]  ;;  %v489_v28 = vld [vmem:[%s587_s2 + $0x4] ss:$0 sm:$0xff] }
   0xa   :  { %79 = vmatpush.msra.mxu0 %v45_v6  ;;  %v495_v30 = vld [vmem:[%s587_s2 + $0x3] ss:$0 sm:$0xff]  ;;  %v500_v31 = vld [vmem:[%s587_s2 + $0x2] ss:$0 sm:$0xff]  ;;  %v507_v35 = vld [vmem:[%s587_s2 + $0x1] ss:$0 sm:$0xff] }
   0xb   :  { %315 = vmatmul.msk.f32.vlgmr.msra.gmra.mxu0 %vm56_vm1, %v44_v7  ;;  %v512_v37 = vld [vmem:[%s587_s2] ss:$0 sm:$0xff] }
   0xc   :  { %316 = vmatpush.msk.msrb.mxu0 %vm60_vm0, %v86_v8  ;;  %v163_v42 = vld [vmem:[%s592_s5] sm:$0xff] }
   0xd   :  { %v222_v51 = vld [vmem:[%s593_s8] sm:$0xff] }
   0xe   :  { %v221_v5 = vld [vmem:[%s594_s7] sm:$0xff] }
  0x13   :  { %317 = vmatmul.msk.f32.vlgmr.msrb.gmra.mxu0 %vm93_vm2, %v85_v9 }
  0x75   :  { %v54_v10 = vpop.permute.xlu0 %53 }
  0x88   :  { %v81_v11 = vpop.f32.mrf.mxu0 }
  0x89   :  { %v82_v12 = vadd.f32 %v81_v11, %v54_v10  ;;  %v278_v10 = vld [vmem:[%s595_s10] sm:$0xff] }
  0x8b   :  { %v84_v13 = vmax.f32 %v82_v12, 0.0 }
  0x8d   :  { %143 = vrot.lane.b32.xlu2 %v84_v13, %s342_s0  ;;  %153 = vrot.lane.b32.xlu1 %v84_v13, %s343_s3  ;;  %v142_v32 = vmul.f32 %v489_v28, %v84_v13 }
  0x8e   :  { %158 = vrot.lane.b32.xlu0 %v84_v13, %s344_s25 }
  0x90   :  { %v117_v43 = vpop.f32.mrf.mxu0 }
  0x95   :  { %135 = vrot.lane.b32.xlu2 %v84_v13, %s345_s1  ;;  %148 = vrot.lane.b32.xlu1 %v84_v13, %s346_s11 }
  0x96   :  { %130 = vrot.lane.b32.xlu0 %v84_v13, %s347_s26 }
  0x9d   :  { %120 = vrot.lane.b32.xlu2 %v84_v13, %s348_s29  ;;  %125 = vrot.lane.b32.xlu1 %v84_v13, %s349_s30 }
  0x9e   :  { %90 = vperm.xlu0 %330, %v87_v14  }
  0xa5   :  { %167 = vperm.xlu1 %331, %v164_v15  }
  0xe7   :  { %v144_v16 = vpop.permute.xlu2 %143 }
  0xe8   :  { %v147_v29 = vmul.f32 %v483_v24, %v144_v16 }
  0xef   :  { %v136_v25 = vpop.permute.xlu2 %135 }
  0xf0   :  { %v139_v34 = vmul.f32 %v495_v30, %v136_v25 }
  0xf7   :  { %v121_v39 = vpop.permute.xlu2 %120 }
  0xf8   :  { %v124_v41 = vmul.f32 %v512_v37, %v121_v39 }
  0xff   :  { %v154_v19 = vpop.permute.xlu1 %153 }
 0x100   :  { %v159_v20 = vpop.permute.xlu0 %158  ;;  %v157_v22 = vmul.f32 %v471_v18, %v154_v19 }
 0x101   :  { %v162_v21 = vmul.f32 %v466_v17, %v159_v20 }
 0x103   :  { %181 = vmatpush.msra.mxu2 %v162_v21 }
 0x105   :  { %182 = vmatpush.msra.mxu2 %v157_v22 }
 0x107   :  { %v149_v26 = vpop.permute.xlu1 %148 }
 0x108   :  { %v152_v27 = vmul.f32 %v478_v23, %v149_v26  ;;  %v131_v33 = vpop.permute.xlu0 %130 }
 0x109   :  { %v134_v38 = vmul.f32 %v500_v31, %v131_v33 }
 0x10a   :  { %183 = vmatpush.msra.mxu2 %v152_v27 }
 0x10c   :  { %184 = vmatpush.msra.mxu2 %v147_v29 }
 0x10e   :  { %185 = vmatpush.msra.mxu2 %v142_v32 }
 0x10f   :  { %v126_v36 = vpop.permute.xlu1 %125 }
 0x110   :  { %186 = vmatpush.msra.mxu2 %v139_v34  ;;  %v129_v40 = vmul.f32 %v507_v35, %v126_v36  ;;  %v91_v44 = vpop.permute.xlu0 %90 }
 0x111   :  { %v118_v47 = vadd.f32 %v117_v43, %v91_v44 }
 0x112   :  { %187 = vmatpush.msra.mxu2 %v134_v38 }
 0x114   :  { %188 = vmatpush.msra.mxu2 %v129_v40 }
 0x116   :  { %189 = vmatpush.msra.mxu2 %v124_v41 }
 0x117   :  { %318 = vmatmul.msk.f32.vlgmr.msra.gmra.mxu2 %vm170_vm3, %v163_v42  ;;  %v168_v45 = vpop.permute.xlu1 %167 }
 0x19a   :  { %v191_v46 = vpop.f32.mrf.mxu2 }
 0x19b   :  { %v192_v48 = vadd.f32 %v191_v46, %v168_v45 }
 0x19d   :  { %v194_v49 = vadd.f32 %v192_v48, %v118_v47 }
 0x19f   :  { %v521_v50 = vmax.f32 %v194_v49, 0.0 }
 0x1a1   :  { %212 = vrot.lane.b32.xlu1 %v521_v50, %s346_s11  ;;  %215 = vrot.lane.b32.xlu0 %v521_v50, %s343_s3  ;;  %v208_v60 = vmul.f32 %v489_v28, %v521_v50 }
 0x1a2   :  { %218 = vrot.lane.b32.xlu2 %v521_v50, %s344_s25 }
 0x1a9   :  { %202 = vrot.lane.b32.xlu1 %v521_v50, %s347_s26  ;;  %205 = vrot.lane.b32.xlu0 %v521_v50, %s345_s1 }
 0x1aa   :  { %209 = vrot.lane.b32.xlu2 %v521_v50, %s342_s0 }
 0x1b1   :  { %225 = vperm.xlu1 %331, %v222_v51   ;;  %196 = vrot.lane.b32.xlu0 %v521_v50, %s348_s29 }
 0x1b2   :  { %199 = vrot.lane.b32.xlu2 %v521_v50, %s349_s30 }
 0x1fc   :  { %v219_v52 = vpop.permute.xlu2 %218 }
 0x1fd   :  { %v220_v53 = vmul.f32 %v466_v17, %v219_v52 }
 0x1ff   :  { %238 = vmatpush.msra.mxu3 %v220_v53 }
 0x204   :  { %v210_v54 = vpop.permute.xlu2 %209 }
 0x205   :  { %v211_v59 = vmul.f32 %v483_v24, %v210_v54 }
 0x20c   :  { %v200_v0 = vpop.permute.xlu2 %199 }
 0x20d   :  { %v201_v2 = vmul.f32 %v507_v35, %v200_v0 }
 0x213   :  { %v213_v55 = vpop.permute.xlu1 %212  ;;  %v216_v56 = vpop.permute.xlu0 %215 }
 0x214   :  { %v217_v57 = vmul.f32 %v471_v18, %v216_v56  ;;  %v214_v58 = vmul.f32 %v478_v23, %v213_v55 }
 0x216   :  { %239 = vmatpush.msra.mxu3 %v217_v57 }
 0x218   :  { %240 = vmatpush.msra.mxu3 %v214_v58 }
 0x21a   :  { %241 = vmatpush.msra.mxu3 %v211_v59 }
 0x21b   :  { %v203_v61 = vpop.permute.xlu1 %202  ;;  %v206_v62 = vpop.permute.xlu0 %205 }
 0x21c   :  { %v207_v63 = vmul.f32 %v495_v30, %v206_v62  ;;  %242 = vmatpush.msra.mxu3 %v208_v60  ;;  %v204_v1 = vmul.f32 %v500_v31, %v203_v61 }
 0x21e   :  { %243 = vmatpush.msra.mxu3 %v207_v63 }
 0x220   :  { %244 = vmatpush.msra.mxu3 %v204_v1 }
 0x222   :  { %245 = vmatpush.msra.mxu3 %v201_v2 }
 0x223   :  { %v197_v3 = vpop.permute.xlu0 %196  ;;  %v226_v6 = vpop.permute.xlu1 %225 }
 0x224   :  { %v198_v4 = vmul.f32 %v512_v37, %v197_v3 }
 0x226   :  { %246 = vmatpush.msra.mxu3 %v198_v4 }
 0x227   :  { %319 = vmatmul.msk.f32.vlgmr.msra.gmra.mxu3 %vm170_vm3, %v221_v5 }
 0x2aa   :  { %v248_v7 = vpop.f32.mrf.mxu3 }
 0x2ab   :  { %v249_v8 = vadd.f32 %v248_v7, %v226_v6 }
 0x2ad   :  { %v251_v9 = vmax.f32 %v249_v8, 0.0 }
 0x2af   :  { %268 = vrot.lane.b32.xlu1 %v251_v9, %s346_s11  ;;  %271 = vrot.lane.b32.xlu0 %v251_v9, %s343_s3  ;;  %v264_v21 = vmul.f32 %v489_v28, %v251_v9  ;;  %v277_v28 = vld [vmem:[%s596_s9] sm:$0xff] }
 0x2b0   :  { %274 = vrot.lane.b32.xlu2 %v251_v9, %s344_s25 }
 0x2b7   :  { %258 = vrot.lane.b32.xlu1 %v251_v9, %s347_s26  ;;  %261 = vrot.lane.b32.xlu0 %v251_v9, %s345_s1 }
 0x2b8   :  { %265 = vrot.lane.b32.xlu2 %v251_v9, %s342_s0 }
 0x2bf   :  { %281 = vperm.xlu1 %331, %v278_v10   ;;  %252 = vrot.lane.b32.xlu0 %v251_v9, %s348_s29 }
 0x2c0   :  { %255 = vrot.lane.b32.xlu2 %v251_v9, %s349_s30 }
 0x30a   :  { %v275_v11 = vpop.permute.xlu2 %274 }
 0x30b   :  { %v276_v12 = vmul.f32 %v466_v17, %v275_v11 }
 0x30d   :  { %294 = vmatpush.msra.mxu1 %v276_v12 }
 0x312   :  { %v266_v13 = vpop.permute.xlu2 %265 }
 0x313   :  { %v267_v20 = vmul.f32 %v483_v24, %v266_v13 }
 0x31a   :  { %v256_v17 = vpop.permute.xlu2 %255 }
 0x321   :  { %v269_v14 = vpop.permute.xlu1 %268  ;;  %v272_v15 = vpop.permute.xlu0 %271 }
 0x322   :  { %v273_v16 = vmul.f32 %v471_v18, %v272_v15  ;;  %v270_v19 = vmul.f32 %v478_v23, %v269_v14  ;;  %v257_v18 = vmul.f32 %v507_v35, %v256_v17 }
 0x324   :  { %295 = vmatpush.msra.mxu1 %v273_v16 }
 0x326   :  { %296 = vmatpush.msra.mxu1 %v270_v19 }
 0x328   :  { %297 = vmatpush.msra.mxu1 %v267_v20 }
 0x329   :  { %v259_v22 = vpop.permute.xlu1 %258  ;;  %v262_v25 = vpop.permute.xlu0 %261 }
 0x32a   :  { %v263_v26 = vmul.f32 %v495_v30, %v262_v25  ;;  %298 = vmatpush.msra.mxu1 %v264_v21  ;;  %v260_v27 = vmul.f32 %v500_v31, %v259_v22 }
 0x32c   :  { %299 = vmatpush.msra.mxu1 %v263_v26 }
 0x32e   :  { %300 = vmatpush.msra.mxu1 %v260_v27 }
 0x330   :  { %301 = vmatpush.msra.mxu1 %v257_v18 }
 0x331   :  { %v253_v23 = vpop.permute.xlu0 %252  ;;  %v282_v29 = vpop.permute.xlu1 %281 }
 0x332   :  { %v254_v24 = vmul.f32 %v512_v37, %v253_v23 }
 0x334   :  { %302 = vmatpush.msra.mxu1 %v254_v24 }
 0x335   :  { %320 = vmatmul.msk.f32.vlgmr.msra.gmra.mxu1 %vm170_vm3, %v277_v28 }
 0x3b2   :  { %v304_v30 = vpop.f32.mrf.mxu1 }
 0x3b3   :  { %v305_v32 = vadd.f32 %v304_v30, %v282_v29 }
 0x3b5   :  { %v307_v31 = vadd.f32 %v305_v32, %v521_v50 }
 0x3b7   :  { %v308_v33 = vmax.f32 %v307_v31, 0.0 }
 0x3b9   :  { %309 = vst [vmem:[%s597_s13] sm:$0xff] %v308_v33 }

</bundles_post_ra>
